<compile_context>
chip_gen: v7x
topology: tpu7x:2x2x1
jax: 0.10.0
libtpu: 0.0.40
codegen_flags: <defaults>
</compile_context>

<pallas_src>
import functools

import jax
import jax.numpy as jnp
from jax.experimental import pallas as pl
from jax.experimental.pallas import tpu as pltpu

BN_EPS = 1e-3  # scvi FCLayers BatchNorm1d eps


def _round_up(x, m):
    return (x + m - 1) // m * m


def _vmem_capacity_bytes():
    """Physical VMEM of the current chip (fallback: 64 MiB, the v7x size)."""
    try:
        info = pltpu.get_tpu_info()
        cap = getattr(info, "vmem_capacity_bytes", None)
        if cap:
            return int(cap)
    except Exception:
        pass
    return 64 << 20


def _cnv_decoder_kernel(x_ref, cats_ref, w1_ref, bn_ref, w2_ref, b2_ref,
                        out_ref, *, n_input, n_cat_list, tn):
    """Fused Linear1 -> BatchNorm(train) -> ReLU -> Linear2 -> Tanh.

    Grid axis 0 tiles the lane-padded output-feature dim.  The hidden layer is
    recomputed per tile (cheap), so every tile is independent -> "parallel".
    """
    j = pl.program_id(0)

    # ---- FCLayers Linear1, continuous part: one MXU dot. ----
    x = x_ref[...].astype(w1_ref.dtype)
    B = x.shape[0]
    h = jnp.dot(x, w1_ref[0:n_input, :], preferred_element_type=jnp.float32)

    # ---- Categorical covariates.  Small n_cat: VPU select-accumulate over
    #      the matching rows of w1 (no extra MXU launch, no one-hot tensor).
    #      Large n_cat: in-kernel one-hot + MXU dot. ----
    off = n_input
    for col, n_cat in enumerate(n_cat_list):
        if n_cat > 1:  # scvi skips one-hot for n_cat <= 1
            c = cats_ref[:, col:col + 1]                       # (B, 1) int32
            if n_cat <= 16:
                for k in range(n_cat):
                    sel = (c == k).astype(jnp.float32)         # (B, 1)
                    h = h + sel * w1_ref[off + k:off + k + 1, :]
            else:
                iota = jax.lax.broadcasted_iota(jnp.int32, (B, n_cat), 1)
                oh = (iota == c).astype(w1_ref.dtype)
                h = h + jnp.dot(oh, w1_ref[off:off + n_cat, :],
                                preferred_element_type=jnp.float32)
            off += n_cat

    # Linear1 bias (kept for exactness vs. the reference; a no-op under
    # train-mode BN and free in the already 8-sublane-padded bn DMA).
    h = h + bn_ref[0:1, :]

    # ---- BatchNorm1d, training mode: batch statistics, biased variance ----
    mean = jnp.mean(h, axis=0, keepdims=True)
    var = jnp.mean((h - mean) ** 2, axis=0, keepdims=True)
    h = (h - mean) * jax.lax.rsqrt(var + BN_EPS)
    h = h * bn_ref[1:2, :] + bn_ref[2:3, :]

    # ---- ReLU (dropout_rate=0 -> identity dropout) ----
    h = jnp.maximum(h, 0.0)

    # ---- fclayer: Linear(n_hidden, n_output) tile + Tanh (lane-dense store) ----
    p = jnp.dot(h.astype(w2_ref.dtype), w2_ref[...],
                preferred_element_type=jnp.float32)
    # b2 is one grid-invariant resident block; slice the tile in-kernel
    # instead of paying a tiny sublane-padded DMA every grid step.
    start = pl.multiple_of(j * tn, tn)
    p = p + b2_ref[:, pl.ds(start, tn)]
    out_ref[...] = jnp.tanh(p).astype(out_ref.dtype)


def cnv_decoder_forward(x, cats, params, n_cat_list, *, use_bf16_weights=False):
    """x: (B, n_input) f32; cats: (B, len(n_cat_list)) int32 category indices."""
    B, n_input = x.shape
    n_in_total, n_hidden = params["w1"].shape
    n_output = params["w2"].shape[1]
    n_cat_list = tuple(int(c) for c in n_cat_list)

    # ---- categorical covariate indices (fail loudly, don't substitute zeros) ----
    if any(c > 1 for c in n_cat_list):
        if cats is None or cats.ndim != 2 or cats.shape[1] != len(n_cat_list):
            raise ValueError(
                "cats must be an int array of shape (batch, len(n_cat_list)) "
                "when categorical covariates are declared")
        cats = cats.astype(jnp.int32)
    else:
        cats = jnp.zeros((B, 1), jnp.int32)   # unused placeholder block
    n_cats = cats.shape[1]

    # ---- lane-dense output: pad output features to a multiple of 128 ----
    n_out_pad = _round_up(n_output, 128)

    w1 = params["w1"]
    w2 = params["w2"]
    b2 = params["b2"]
    if n_out_pad != n_output:
        w2 = jnp.pad(w2, ((0, 0), (0, n_out_pad - n_output)))
        b2 = jnp.pad(b2, ((0, 0), (0, n_out_pad - n_output)))
    if use_bf16_weights:
        # Optional bandwidth saver for large n_output (f32 accumulation kept);
        # off by default to preserve exact f32 semantics.
        w1 = w1.astype(jnp.bfloat16)
        w2 = w2.astype(jnp.bfloat16)
    wbytes = 2 if use_bf16_weights else 4

    # Fuse b1 / gamma / beta into one (3, n_hidden) VMEM block (one DMA).
    bn = jnp.concatenate([params["b1"], params["gamma"], params["beta"]],
                         axis=0).astype(jnp.float32)

    # ---- tile-size selection: largest output tile fitting the
    #      generation-aware VMEM budget; single step when everything fits ----
    vmem_cap = _vmem_capacity_bytes()
    vmem_budget = vmem_cap * 3 // 4          # headroom for compiler internals
    B_pad = _round_up(B, 8)
    # Grid-invariant blocks (BlockSpec still double-buffers by default).
    fixed_bytes = 2 * (4 * B_pad * _round_up(n_input, 128)          # x
                       + 4 * B_pad * _round_up(n_cats, 128)         # cats
                       + wbytes * _round_up(n_in_total, 8) * n_hidden   # w1
                       + 4 * 8 * n_hidden                           # bn (3->8 rows)
                       + 4 * 8 * n_out_pad)                         # b2 (1->8 rows)
    # Per-output-lane cost of the tiled blocks (w2 tile + out tile, x2 buffers).
    per_lane = 2 * (wbytes * n_hidden + 4 * B_pad)
    lanes_budget = max(128, (vmem_budget - fixed_bytes) // per_lane)
    tn_cap = max(128, lanes_budget // 128 * 128)
    if n_out_pad <= tn_cap:
        tn = n_out_pad                       # single grid step
    else:
        tn = 128
        for cand in range(tn_cap, 0, -128):  # largest 128-multiple divisor
            if n_out_pad % cand == 0:
                tn = cand
                break
    n_tiles = n_out_pad // tn

    # Actual VMEM use + modest fixed headroom (no double hedging), clamped
    # below this generation's physical VMEM.
    used_bytes = fixed_bytes + per_lane * tn
    vmem_limit = int(min(max(used_bytes + (4 << 20), 16 << 20),
                         vmem_cap - (8 << 20)))

    # Advisory cost estimate for the XLA scheduler.
    flops = int(n_tiles * (2 * B * n_in_total * n_hidden + 10 * B * n_hidden)
                + 2 * B * n_hidden * n_out_pad)
    bytes_accessed = int(4 * (x.size + cats.size + bn.size + b2.size
                              + B * n_out_pad)
                         + wbytes * (w1.size + w2.size))
    cost = pl.CostEstimate(flops=flops,
                           transcendentals=int(B * n_out_pad + n_tiles * n_hidden),
                           bytes_accessed=bytes_accessed)

    kernel = pl.pallas_call(
        functools.partial(_cnv_decoder_kernel, n_input=n_input,
                          n_cat_list=n_cat_list, tn=tn),
        out_shape=jax.ShapeDtypeStruct((B, n_out_pad), jnp.float32),
        grid=(n_tiles,),
        in_specs=[
            pl.BlockSpec((B, n_input), lambda j: (0, 0)),            # x
            pl.BlockSpec((B, n_cats), lambda j: (0, 0)),             # cats (int32)
            pl.BlockSpec((n_in_total, n_hidden), lambda j: (0, 0)),  # w1
            pl.BlockSpec((3, n_hidden), lambda j: (0, 0)),           # [b1; gamma; beta]
            pl.BlockSpec((n_hidden, tn), lambda j: (0, j)),          # w2 tile
            pl.BlockSpec((1, n_out_pad), lambda j: (0, 0)),          # b2 (resident)
        ],
        out_specs=pl.BlockSpec((B, tn), lambda j: (0, j)),
        compiler_params=pltpu.CompilerParams(
            # Tiles are fully independent (hidden layer recomputed per tile),
            # so the grid axis can shard across v7x's two TensorCores.
            dimension_semantics=("parallel",),
            vmem_limit_bytes=vmem_limit),
        cost_estimate=cost,
    )
    out = kernel(x.astype(jnp.float32), cats, w1, bn, w2, b2.astype(jnp.float32))
    return out[:, :n_output]


def init_params(key, n_in_total, n_hidden, n_output):
    """Deterministic synthetic parameter init (PyTorch-like uniform ranges)."""
    k1, k2, k3, k4 = jax.random.split(key, 4)
    lim1 = 1.0 / jnp.sqrt(n_in_total)
    lim2 = 1.0 / jnp.sqrt(n_hidden)
    return {
        "w1": jax.random.uniform(k1, (n_in_total, n_hidden), jnp.float32, -lim1, lim1),
        "b1": jax.random.uniform(k2, (1, n_hidden), jnp.float32, -lim1, lim1),
        "gamma": jnp.ones((1, n_hidden), jnp.float32),   # BatchNorm weight init
        "beta": jnp.zeros((1, n_hidden), jnp.float32),   # BatchNorm bias init
        "w2": jax.random.uniform(k3, (n_hidden, n_output), jnp.float32, -lim2, lim2),
        "b2": jax.random.uniform(k4, (1, n_output), jnp.float32, -lim2, lim2),
    }


def reference_forward(x, cats, params, n_cat_list):
    """Pure-JAX reference (one_hot + concat, exactly as the PyTorch module)."""
    feats = [x]
    for i, n_cat in enumerate(n_cat_list):
        if n_cat > 1:
            feats.append(jax.nn.one_hot(cats[:, i], n_cat, dtype=x.dtype))
    xf = jnp.concatenate(feats, axis=-1)
    h = xf @ params["w1"] + params["b1"]
    mean = jnp.mean(h, axis=0, keepdims=True)
    var = jnp.mean((h - mean) ** 2, axis=0, keepdims=True)
    h = (h - mean) / jnp.sqrt(var + BN_EPS) * params["gamma"] + params["beta"]
    h = jnp.maximum(h, 0.0)
    return jnp.tanh(h @ params["w2"] + params["b2"])


if __name__ == "__main__":
    # Small shapes consistent with the module's forward:
    #   n_input (latent) = 16, n_hidden = 128, n_output (CNV data dim) = 32,
    #   n_cat_list = [3]  (one categorical covariate, one-hot injected)
    B, n_input, n_hidden, n_output = 8, 16, 128, 32
    n_cat_list = (3,)
    n_in_total = n_input + sum(c for c in n_cat_list if c > 1)

    key = jax.random.PRNGKey(0)
    kx, kc, kp = jax.random.split(key, 3)
    x = jax.random.normal(kx, (B, n_input), jnp.float32)
    cats = jax.random.randint(kc, (B, len(n_cat_list)), 0, n_cat_list[0], jnp.int32)
    params = init_params(kp, n_in_total, n_hidden, n_output)

    out = cnv_decoder_forward(x, cats, params, n_cat_list)
    out = jax.block_until_ready(out)

    ref = reference_forward(x, cats, params, n_cat_list)
    assert out.shape == (B, n_output)
    assert jnp.allclose(out, ref, atol=1e-5, rtol=1e-5), "mismatch vs JAX reference"

    print("KERNEL_OK")
</pallas_src>

<mosaic_0001>
module attributes {stable_mosaic.version = 11 : i64} {
  func.func @_cnv_decoder_kernel(%arg0: i32, %arg1: memref<8x16xf32, #tpu.memory_space<vmem>>, %arg2: memref<8x1xi32, #tpu.memory_space<vmem>>, %arg3: memref<19x128xf32, #tpu.memory_space<vmem>>, %arg4: memref<3x128xf32, #tpu.memory_space<vmem>>, %arg5: memref<128x128xf32, #tpu.memory_space<vmem>>, %arg6: memref<1x128xf32, #tpu.memory_space<vmem>>, %arg7: memref<8x128xf32, #tpu.memory_space<vmem>>) attributes {dimension_semantics = [#tpu.dimension_semantics<parallel>], iteration_bounds = array<i64: 1>, scalar_prefetch = 0 : i64, scratch_operands = 0 : i64, tpu.core_type = #tpu.core_type<tc>, window_params = [{pipeline_mode = #tpu.pipeline_mode<synchronous>, transform_indices = @transform_0, window_bounds = array<i64: 8, 16>}, {pipeline_mode = #tpu.pipeline_mode<synchronous>, transform_indices = @transform_1, window_bounds = array<i64: 8, 1>}, {pipeline_mode = #tpu.pipeline_mode<synchronous>, transform_indices = @transform_2, window_bounds = array<i64: 19, 128>}, {pipeline_mode = #tpu.pipeline_mode<synchronous>, transform_indices = @transform_3, window_bounds = array<i64: 3, 128>}, {transform_indices = @transform_4, window_bounds = array<i64: 128, 128>}, {pipeline_mode = #tpu.pipeline_mode<synchronous>, transform_indices = @transform_5, window_bounds = array<i64: 1, 128>}, {transform_indices = @transform_6, window_bounds = array<i64: 8, 128>}]} {
    %c0 = arith.constant 0 : index
    %c0_0 = arith.constant 0 : index
    %0 = vector.load %arg1[%c0, %c0_0] : memref<8x16xf32, #tpu.memory_space<vmem>>, vector<8x16xf32>
    %c0_1 = arith.constant 0 : index
    %c0_2 = arith.constant 0 : index
    %1 = vector.load %arg3[%c0_1, %c0_2] : memref<19x128xf32, #tpu.memory_space<vmem>>, vector<16x128xf32>
    %cst = arith.constant dense<0.000000e+00> : vector<8x128xf32>
    %2 = tpu.matmul %0, %1, %cst {dimension_numbers = #tpu.dot_dimension_numbers<[1], [0], [0], [1], [0, 0, 1, 1], [], []>} : vector<8x16xf32>, vector<16x128xf32>, vector<8x128xf32> -> vector<8x128xf32>
    %c0_3 = arith.constant 0 : index
    %c0_4 = arith.constant 0 : index
    %3 = vector.load %arg2[%c0_3, %c0_4] : memref<8x1xi32, #tpu.memory_space<vmem>>, vector<8x1xi32>
    %c0_i32 = arith.constant 0 : i32
    %4 = vector.broadcast %c0_i32 : i32 to vector<8x1xi32>
    %5 = arith.cmpi eq, %3, %4 : vector<8x1xi32>
    %6 = arith.extui %5 : vector<8x1xi1> to vector<8x1xi32>
    %7 = arith.sitofp %6 : vector<8x1xi32> to vector<8x1xf32>
    %c16 = arith.constant 16 : index
    %c0_5 = arith.constant 0 : index
    %8 = vector.load %arg3[%c16, %c0_5] : memref<19x128xf32, #tpu.memory_space<vmem>>, vector<1x128xf32>
    %9 = vector.broadcast %7 : vector<8x1xf32> to vector<8x128xf32>
    %10 = vector.broadcast %8 : vector<1x128xf32> to vector<8x128xf32>
    %11 = arith.mulf %9, %10 : vector<8x128xf32>
    %12 = arith.addf %2, %11 : vector<8x128xf32>
    %c1_i32 = arith.constant 1 : i32
    %13 = vector.broadcast %c1_i32 : i32 to vector<8x1xi32>
    %14 = arith.cmpi eq, %3, %13 : vector<8x1xi32>
    %15 = arith.extui %14 : vector<8x1xi1> to vector<8x1xi32>
    %16 = arith.sitofp %15 : vector<8x1xi32> to vector<8x1xf32>
    %c17 = arith.constant 17 : index
    %c0_6 = arith.constant 0 : index
    %17 = vector.load %arg3[%c17, %c0_6] : memref<19x128xf32, #tpu.memory_space<vmem>>, vector<1x128xf32>
    %18 = vector.broadcast %16 : vector<8x1xf32> to vector<8x128xf32>
    %19 = vector.broadcast %17 : vector<1x128xf32> to vector<8x128xf32>
    %20 = arith.mulf %18, %19 : vector<8x128xf32>
    %21 = arith.addf %12, %20 : vector<8x128xf32>
    %c2_i32 = arith.constant 2 : i32
    %22 = vector.broadcast %c2_i32 : i32 to vector<8x1xi32>
    %23 = arith.cmpi eq, %3, %22 : vector<8x1xi32>
    %24 = arith.extui %23 : vector<8x1xi1> to vector<8x1xi32>
    %25 = arith.sitofp %24 : vector<8x1xi32> to vector<8x1xf32>
    %c18 = arith.constant 18 : index
    %c0_7 = arith.constant 0 : index
    %26 = vector.load %arg3[%c18, %c0_7] : memref<19x128xf32, #tpu.memory_space<vmem>>, vector<1x128xf32>
    %27 = vector.broadcast %25 : vector<8x1xf32> to vector<8x128xf32>
    %28 = vector.broadcast %26 : vector<1x128xf32> to vector<8x128xf32>
    %29 = arith.mulf %27, %28 : vector<8x128xf32>
    %30 = arith.addf %21, %29 : vector<8x128xf32>
    %c0_8 = arith.constant 0 : index
    %c0_9 = arith.constant 0 : index
    %31 = vector.load %arg4[%c0_8, %c0_9] : memref<3x128xf32, #tpu.memory_space<vmem>>, vector<1x128xf32>
    %32 = vector.broadcast %31 : vector<1x128xf32> to vector<8x128xf32>
    %33 = arith.addf %30, %32 : vector<8x128xf32>
    %cst_10 = arith.constant dense<0.000000e+00> : vector<128xf32>
    %34 = vector.multi_reduction <add>, %33, %cst_10 [0] : vector<8x128xf32> to vector<128xf32>
    %35 = vector.shape_cast %34 : vector<128xf32> to vector<1x128xf32>
    %cst_11 = arith.constant 8.000000e+00 : f32
    %36 = vector.broadcast %cst_11 : f32 to vector<1x128xf32>
    %37 = arith.divf %35, %36 : vector<1x128xf32>
    %38 = vector.broadcast %37 : vector<1x128xf32> to vector<8x128xf32>
    %39 = arith.subf %33, %38 : vector<8x128xf32>
    %40 = arith.mulf %39, %39 : vector<8x128xf32>
    %cst_12 = arith.constant dense<0.000000e+00> : vector<128xf32>
    %41 = vector.multi_reduction <add>, %40, %cst_12 [0] : vector<8x128xf32> to vector<128xf32>
    %42 = vector.shape_cast %41 : vector<128xf32> to vector<1x128xf32>
    %cst_13 = arith.constant 8.000000e+00 : f32
    %43 = vector.broadcast %cst_13 : f32 to vector<1x128xf32>
    %44 = arith.divf %42, %43 : vector<1x128xf32>
    %45 = vector.broadcast %37 : vector<1x128xf32> to vector<8x128xf32>
    %46 = arith.subf %33, %45 : vector<8x128xf32>
    %cst_14 = arith.constant 1.000000e-03 : f32
    %47 = vector.broadcast %cst_14 : f32 to vector<1x128xf32>
    %48 = arith.addf %44, %47 : vector<1x128xf32>
    %49 = math.rsqrt %48 : vector<1x128xf32>
    %50 = vector.broadcast %49 : vector<1x128xf32> to vector<8x128xf32>
    %51 = arith.mulf %46, %50 : vector<8x128xf32>
    %c1 = arith.constant 1 : index
    %c0_15 = arith.constant 0 : index
    %52 = vector.load %arg4[%c1, %c0_15] : memref<3x128xf32, #tpu.memory_space<vmem>>, vector<1x128xf32>
    %53 = vector.broadcast %52 : vector<1x128xf32> to vector<8x128xf32>
    %54 = arith.mulf %51, %53 : vector<8x128xf32>
    %c2 = arith.constant 2 : index
    %c0_16 = arith.constant 0 : index
    %55 = vector.load %arg4[%c2, %c0_16] : memref<3x128xf32, #tpu.memory_space<vmem>>, vector<1x128xf32>
    %56 = vector.broadcast %55 : vector<1x128xf32> to vector<8x128xf32>
    %57 = arith.addf %54, %56 : vector<8x128xf32>
    %cst_17 = arith.constant 0.000000e+00 : f32
    %58 = vector.broadcast %cst_17 : f32 to vector<8x128xf32>
    %59 = arith.maximumf %57, %58 : vector<8x128xf32>
    %c0_18 = arith.constant 0 : index
    %c0_19 = arith.constant 0 : index
    %60 = vector.load %arg5[%c0_18, %c0_19] : memref<128x128xf32, #tpu.memory_space<vmem>>, vector<128x128xf32>
    %cst_20 = arith.constant dense<0.000000e+00> : vector<8x128xf32>
    %61 = tpu.matmul %59, %60, %cst_20 {dimension_numbers = #tpu.dot_dimension_numbers<[1], [0], [0], [1], [0, 0, 1, 1], [], []>} : vector<8x128xf32>, vector<128x128xf32>, vector<8x128xf32> -> vector<8x128xf32>
    %c128_i32 = arith.constant 128 : i32
    %62 = arith.muli %arg0, %c128_i32 : i32
    %63 = tpu.assume_multiple %62, 128 : i32
    %c0_21 = arith.constant 0 : index
    %64 = arith.index_cast %63 : i32 to index
    %65 = vector.load %arg6[%c0_21, %64] : memref<1x128xf32, #tpu.memory_space<vmem>>, vector<1x128xf32>
    %66 = vector.broadcast %65 : vector<1x128xf32> to vector<8x128xf32>
    %67 = arith.addf %61, %66 : vector<8x128xf32>
    %68 = math.tanh %67 : vector<8x128xf32>
    %c0_22 = arith.constant 0 : index
    %c0_23 = arith.constant 0 : index
    %69 = vector.load %arg7[%c0_22, %c0_23] : memref<8x128xf32, #tpu.memory_space<vmem>>, vector<8x128xf32>
    tpu.vector_store %arg7[%c0_22, %c0_23], %68 {strides = array<i32>} : memref<8x128xf32, #tpu.memory_space<vmem>>, vector<8x128xf32>,
    return
  }
  func.func @transform_0(%arg0: i32) -> (i32, i32) {
    %c0_i32 = arith.constant 0 : i32
    %c0_i32_0 = arith.constant 0 : i32
    %c0_i32_1 = arith.constant 0 : i32
    return %c0_i32, %c0_i32_0 : i32, i32
  }
  func.func @transform_1(%arg0: i32) -> (i32, i32) {
    %c0_i32 = arith.constant 0 : i32
    %c0_i32_0 = arith.constant 0 : i32
    %c0_i32_1 = arith.constant 0 : i32
    return %c0_i32, %c0_i32_0 : i32, i32
  }
  func.func @transform_2(%arg0: i32) -> (i32, i32) {
    %c0_i32 = arith.constant 0 : i32
    %c0_i32_0 = arith.constant 0 : i32
    %c0_i32_1 = arith.constant 0 : i32
    return %c0_i32, %c0_i32_0 : i32, i32
  }
  func.func @transform_3(%arg0: i32) -> (i32, i32) {
    %c0_i32 = arith.constant 0 : i32
    %c0_i32_0 = arith.constant 0 : i32
    %c0_i32_1 = arith.constant 0 : i32
    return %c0_i32, %c0_i32_0 : i32, i32
  }
  func.func @transform_4(%arg0: i32) -> (i32, i32) {
    %c0_i32 = arith.constant 0 : i32
    %c0_i32_0 = arith.constant 0 : i32
    return %c0_i32, %arg0 : i32, i32
  }
  func.func @transform_5(%arg0: i32) -> (i32, i32) {
    %c0_i32 = arith.constant 0 : i32
    %c0_i32_0 = arith.constant 0 : i32
    %c0_i32_1 = arith.constant 0 : i32
    return %c0_i32, %c0_i32_0 : i32, i32
  }
  func.func @transform_6(%arg0: i32) -> (i32, i32) {
    %c0_i32 = arith.constant 0 : i32
    %c0_i32_0 = arith.constant 0 : i32
    return %c0_i32, %arg0 : i32, i32
  }
}

</mosaic_0001>

<bundles_post_ra>
// kernel: tpu_custom_call.1
= control target key start
LH: loop header
LB: loop body
LE: loop exit
PB: predicated region body
PF: predicated region fallthrough
CT: control target
= control target key end

     0   :  { %11 = vsyncpa [#allocation3], 0  ;;  %s623_s0 = inlined_call_operand.vmem [shape: f32[8,16], index: 0, kind: input, shape index: {}]   ;;  %s624_s1 = inlined_call_operand.vmem [shape: s32[8,1], index: 1, kind: input, shape index: {}]   ;;  %s625_s2 = inlined_call_operand.hbm [shape: f32[19,128], index: 2, kind: input, shape index: {}]   ;;  %s626_s3 = inlined_call_operand.vmem [shape: f32[3,128], index: 3, kind: input, shape index: {}]   ;;  %s627_s4 = inlined_call_operand.hbm [shape: f32[128,128], index: 4, kind: input, shape index: {}]   ;;  %s628_s5 = inlined_call_operand.vmem [shape: f32[1,128], index: 5, kind: input, shape index: {}]   ;;  %s629_s6 = inlined_call_operand.hbm [shape: f32[8,128], index: 6, kind: output, shape index: {}]  }
   0x1   :  { %12 = vsyncpa [#allocation6], 0 }
   0x2   :  { %13 = vsyncpa [#allocation4], 0  ;;  %s516_s21 = smov [#allocation2]   ;;  %s444_s25 = scalar_lea.hbm %s625_s2, 384 }
   0x3   :  { %s23_s22 = sshll.u32 %s516_s21, 4  ;;  %p445_p0 = scmp.ne.s32.totalorder %s625_s2, %s444_s25  ;;  %s24_s22 = int_to_ptr.vmem [resolvable:$true] %s23_s22 }
   0x4   :  { %p448_p1 = scmp.lt.u32.totalorder %s444_s25, %s625_s2 }
   0x6   :  { %p450_p2 = pnand %p448_p1, %p445_p0 }
   0x8   :  { %453 = shalt.err (!%p450_p2)
}
   0x9   :  { %s454_s30 = scalar_lea.vmem %s24_s22, 384  ;;  %p459_p4 = scmp.lt.s32.totalorder %s24_s22, %s24_s22 }
   0xa   :  { %p455_p3 = scmp.ne.s32.totalorder %s24_s22, %s454_s30  ;;  %p460_p5 = scmp.lt.s32.totalorder %s454_s30, %s454_s30 }
   0xc   :  { %p461_p6 = por %p460_p5, %p459_p4 }
   0xe   :  { %p462_p7 = pnand %p461_p6, %p455_p3 }
  0x10   :  { %465 = shalt.err (!%p462_p7)
}
  0x11   :  { %s517_s7 = smov 128   ;;  %s518_s8 = smov 8  }
  0x12   :  { %29 = dma.hbm_to_vmem [thread:$0]  %s625_s2, 384, %s24_s22, [#allocation3], %s517_s7, %s517_s7, %s518_s8  }
  0x13   :  { %s519_s11 = smov [#allocation5]   ;;  %s466_s15 = scalar_lea.hbm %s627_s4, 2048 }
  0x14   :  { %s37_s12 = sshll.u32 %s519_s11, 4  ;;  %p467_p8 = scmp.ne.s32.totalorder %s627_s4, %s466_s15  ;;  %s38_s12 = int_to_ptr.vmem [resolvable:$true] %s37_s12 }
  0x15   :  { %p470_p9 = scmp.lt.u32.totalorder %s466_s15, %s627_s4 }
  0x17   :  { %p472_p10 = pnand %p470_p9, %p467_p8 }
  0x19   :  { %475 = shalt.err (!%p472_p10)
}
  0x1a   :  { %s476_s20 = scalar_lea.vmem %s38_s12, 2048  ;;  %p481_p12 = scmp.lt.s32.totalorder %s38_s12, %s38_s12 }
  0x1b   :  { %p477_p11 = scmp.ne.s32.totalorder %s38_s12, %s476_s20  ;;  %p482_p13 = scmp.lt.s32.totalorder %s476_s20, %s476_s20 }
  0x1d   :  { %p483_p0 = por %p482_p13, %p481_p12 }
  0x1f   :  { %p484_p1 = pnand %p483_p0, %p477_p11 }
  0x21   :  { %487 = shalt.err (!%p484_p1)
}
  0x22   :  { %43 = dma.hbm_to_vmem [thread:$0]  %s627_s4, 2048, %s38_s12, [#allocation6], %s517_s7, %s517_s7, %s518_s8  }
  0x23   :  { %510 = dma.done.wait [#allocation3], 384  }
  0x24   :  { %511 = vsyncadd [#allocation3], 4294966912 }
  0x25   :  { %512 = dma.done.wait [#allocation6], 2048  }
  0x26   :  { %513 = vsyncadd [#allocation6], 4294965248  ;;  %v520_v0 = vmov 0.0|0.0   ;;  %vm521_vm0 = vmmov 0   ;;  %v522_v1 = vmov 0.0   ;;  %v523_v2 = vmov 0  }
  0x27   :  { %402 = vmatprep.subr.bf16.mxu0 %v520_v0  ;;  %364 = vmatprep.mubr.msk.f32.mxu0 %vm521_vm0, %v522_v1  ;;  %v53_v3 = vld [vmem:[#allocation2] sm:$0xff]  ;;  %v54_v4 = vld [vmem:[#allocation2 + $0x8] sm:$0xff]  ;;  %vm70_vm4 = vcmask 130048   ;;  %v213_v11 = vld [vmem:[#allocation5] sm:$0xff]  ;;  %s524_s7 = smov [#allocation7]  }
  0x28   :  { %438 = vset.pattern.permute.xlu0 %v523_v2  ;;  %439 = vset.pattern.permute.xlu1 %v523_v2  ;;  %v403_v5 = vpack.c.bf16 %v54_v4, %v53_v3  ;;  %v55_v6 = vld [vmem:[%s624_s1] sm:$0xff]  ;;  %v215_v14 = vld [vmem:[#allocation5 + $0x10] sm:$0xff]  ;;  %v216_v15 = vld [vmem:[#allocation5 + $0x18] sm:$0xff]  ;;  %s318_s8 = sshll.u32 %s524_s7, 4  ;;  %s319_s8 = int_to_ptr.vmem [resolvable:$true] %s318_s8 }
  0x29   :  { %405 = vmatprep.subr.bf16.mxu1 %v520_v0  ;;  %399 = vmatprep.mubr.msk.f32.mxu1 %vm521_vm0, %v522_v1  ;;  %vm56_vm1 = vcmp.eq.s32.totalorder %v55_v6, 0  ;;  %vm144_vm2 = vcmp.eq.s32.totalorder %v55_v6, 1  ;;  %vm159_vm3 = vcmp.eq.s32.totalorder %v55_v6, 2  ;;  %v52_v7 = vld [vmem:[%s623_s0] sm:$0xff]  ;;  %v409_v16 = vpack.c.bf16 %v216_v15, %v215_v14  ;;  %v217_v17 = vld [vmem:[#allocation5 + $0x20] sm:$0xff]  ;;  %v219_v20 = vld [vmem:[#allocation5 + $0x30] sm:$0xff]  ;;  %p493_p3 = scmp.lt.s32.totalorder %s319_s8, %s319_s8 }
  0x2a   :  { %404 = vmatpush3.bf16.msra.mxu0 %v403_v5  ;;  %v329_v8 = vsel %vm56_vm1, 1.0, %v522_v1  ;;  %v334_v9 = vsel %vm159_vm3, 1.0, %v522_v1  ;;  %v332_v10 = vsel %vm144_vm2, 1.0, %v522_v1  ;;  %v214_v12 = vld [vmem:[#allocation5 + $0x8] sm:$0xff]  ;;  %v220_v21 = vld [vmem:[#allocation5 + $0x38] sm:$0xff]  ;;  %v221_v23 = vld [vmem:[#allocation5 + $0x40] sm:$0xff] }
  0x2b   :  { %62 = vperm.xlu0 %438, %v329_v8   ;;  %165 = vperm.xlu1 %439, %v334_v9   ;;  %v406_v13 = vpack.c.bf16 %v214_v12, %v213_v11  ;;  %v218_v18 = vld [vmem:[#allocation5 + $0x28] sm:$0xff]  ;;  %v415_v22 = vpack.c.bf16 %v220_v21, %v219_v20  ;;  %v223_v26 = vld [vmem:[#allocation5 + $0x50] sm:$0xff]  ;;  %v224_v27 = vld [vmem:[#allocation5 + $0x58] sm:$0xff]  ;;  %s488_s9 = scalar_lea.vmem %s319_s8, 128 }
  0x2c   :  { %v412_v19 = vpack.c.bf16 %v218_v18, %v217_v17  ;;  %v222_v24 = vld [vmem:[#allocation5 + $0x48] sm:$0xff]  ;;  %v421_v28 = vpack.c.bf16 %v224_v27, %v223_v26  ;;  %v225_v29 = vld [vmem:[#allocation5 + $0x60] sm:$0xff]  ;;  %v227_v32 = vld [vmem:[#allocation5 + $0x70] sm:$0xff]  ;;  %p489_p2 = scmp.ne.s32.totalorder %s319_s8, %s488_s9  ;;  %p494_p4 = scmp.lt.s32.totalorder %s488_s9, %s488_s9 }
  0x2d   :  { %365 = vmatmul.mubr.msk.f32.vlgmr.msra.gmra.mrb[0].mxu0 %vm70_vm4, %v52_v7  ;;  %407 = vmatpush3.bf16.msra.mxu1 %v406_v13  ;;  %v418_v25 = vpack.c.bf16 %v222_v24, %v221_v23  ;;  %v226_v30 = vld [vmem:[#allocation5 + $0x68] sm:$0xff]  ;;  %v228_v33 = vld [vmem:[#allocation5 + $0x78] sm:$0xff] }
  0x2e   :  { %408 = vmatprep.subr.bf16.mxu1 %v520_v0  ;;  %v424_v31 = vpack.c.bf16 %v226_v30, %v225_v29  ;;  %v427_v34 = vpack.c.bf16 %v228_v33, %v227_v32  ;;  %v330_v36 = vld [vmem:[#allocation2 + $0x10] ss:$0 sm:$0xff]  ;;  %v333_v37 = vld [vmem:[#allocation2 + $0x11] ss:$0 sm:$0xff]  ;;  %v335_v39 = vld [vmem:[#allocation2 + $0x12] ss:$0 sm:$0xff]  ;;  %p495_p5 = por %p494_p4, %p493_p3 }
  0x2f   :  { %150 = vperm.xlu0 %438, %v332_v10   ;;  %v336_v48 = vld [vmem:[%s626_s3] ss:$0 sm:$0xff]  ;;  %v337_v5 = vld [vmem:[%s626_s3 + $0x1] ss:$0 sm:$0xff]  ;;  %v338_v7 = vld [vmem:[%s626_s3 + $0x2] ss:$0 sm:$0xff] }
  0x30   :  { %v339_v11 = vld [vmem:[%s628_s5] ss:$0 sm:$0xff]  ;;  %p496_p6 = pnand %p495_p5, %p489_p2 }
  0x31   :  { %410 = vmatpush3.bf16.msra.mxu1 %v409_v16 }
  0x32   :  { %411 = vmatprep.subr.bf16.mxu1 %v520_v0 }
  0x35   :  { %413 = vmatpush3.bf16.msra.mxu1 %v412_v19 }
  0x36   :  { %414 = vmatprep.subr.bf16.mxu1 %v520_v0 }
  0x39   :  { %416 = vmatpush3.bf16.msra.mxu1 %v415_v22 }
  0x3a   :  { %417 = vmatprep.subr.bf16.mxu1 %v520_v0 }
  0x3d   :  { %419 = vmatpush3.bf16.msra.mxu1 %v418_v25 }
  0x3e   :  { %420 = vmatprep.subr.bf16.mxu1 %v520_v0 }
  0x41   :  { %422 = vmatpush3.bf16.msra.mxu1 %v421_v28 }
  0x42   :  { %423 = vmatprep.subr.bf16.mxu1 %v520_v0 }
  0x45   :  { %425 = vmatpush3.bf16.msra.mxu1 %v424_v31 }
  0x46   :  { %426 = vmatprep.subr.bf16.mxu1 %v520_v0 }
  0x49   :  { %428 = vmatpush3.bf16.msra.mxu1 %v427_v34 }
  0xaa   :  { %v63_v35 = vpop.permute.xlu0 %62  ;;  %v166_v40 = vpop.permute.xlu1 %165 }
  0xab   :  { %v69_v41 = vmul.f32 %v330_v36, %v63_v35  ;;  %v172_v46 = vmul.f32 %v335_v39, %v166_v40 }
  0xae   :  { %v151_v38 = vpop.permute.xlu0 %150 }
  0xaf   :  { %v157_v43 = vmul.f32 %v333_v37, %v151_v38 }
 0x100   :  { %v140_v42 = vpop.f32.mrb[0].mxu0 }
 0x101   :  { %v141_v44 = vadd.f32 %v140_v42, %v69_v41  ;;  %v366_v45 = vpop.f32.mrb[1].mxu0 }
 0x103   :  { %v158_v47 = vadd.f32 %v157_v43, %v141_v44 }
 0x105   :  { %v173_v49 = vadd.f32 %v172_v46, %v158_v47 }
 0x107   :  { %v179_v50 = vadd.f32 %v336_v48, %v173_v49 }
 0x109   :  { %v180_v51 = vrot.slane %v179_v50, 4 }
 0x10b   :  { %v181_v52 = vadd.f32 %v180_v51, %v179_v50 }
 0x10d   :  { %v182_v53 = vrot.slane %v181_v52, 2 }
 0x10f   :  { %v183_v54 = vadd.f32 %v182_v53, %v181_v52 }
 0x111   :  { %v184_v55 = vrot.slane %v183_v54, 1 }
 0x113   :  { %v185_v56 = vadd.f32 %v184_v55, %v183_v54 }
 0x115   :  { %v187_v57 = vmul.f32 0.125, %v185_v56 }
 0x117   :  { %v188_v58 = vsub.f32 %v179_v50, %v187_v57 }
 0x119   :  { %v189_v59 = vmul.f32 %v188_v58, %v188_v58 }
 0x11b   :  { %v190_v60 = vrot.slane %v189_v59, 4 }
 0x11d   :  { %v191_v61 = vadd.f32 %v190_v60, %v189_v59 }
 0x11f   :  { %v192_v62 = vrot.slane %v191_v61, 2 }
 0x121   :  { %v193_v63 = vadd.f32 %v192_v62, %v191_v61 }
 0x123   :  { %v194_v0 = vrot.slane %v193_v63, 1 }
 0x125   :  { %v195_v1 = vadd.f32 %v194_v0, %v193_v63 }
 0x127   :  { %v196_v2 = vmul.f32 0.125, %v195_v1 }
 0x129   :  { %v197_v3 = vadd.f32 0.001, %v196_v2 }
 0x12b   :  { %440 = vrsqrt.f32 %v197_v3 }
 0x135   :  { %v441_v4 = vpop.eup %440 }
 0x136   :  { %v199_v6 = vmul.f32 %v441_v4, %v188_v58 }
 0x138   :  { %v205_v8 = vmul.f32 %v337_v5, %v199_v6 }
 0x13a   :  { %v211_v9 = vadd.f32 %v338_v7, %v205_v8 }
 0x13c   :  { %v212_v10 = vmax.f32 %v211_v9, 0.0 }
 0x13e   :  { %400 = vmatmul.mubr.f32.vlgmr.msra.gmra.mrb[0].mxu1 %v212_v10 }
 0x211   :  { %v306_v12 = vpop.f32.mrb[0].mxu1 }
 0x212   :  { %v307_v13 = vadd.f32 %v339_v11, %v306_v12  ;;  %v401_v14 = vpop.f32.mrb[1].mxu1 }
 0x214   :  { %442 = vtanh.f32 %v307_v13 }
 0x21e   :  { %v443_v15 = vpop.eup %442 }
 0x21f   :  { %311 = vst [vmem:[#allocation7] sm:$0xff] %v443_v15 }
 0x220   :  { %499 = shalt.err (!%p496_p6)
}
 0x221   :  { %s500_s5 = scalar_lea.hbm %s629_s6, 128 }
 0x222   :  { %p501_p7 = scmp.ne.s32.totalorder %s629_s6, %s500_s5  ;;  %p504_p8 = scmp.lt.u32.totalorder %s500_s5, %s629_s6 }
 0x224   :  { %p506_p9 = pnand %p504_p8, %p501_p7 }
 0x226   :  { %509 = shalt.err (!%p506_p9)
}
 0x227   :  { %321 = dma.vmem_to_hbm [thread:$0]  %s319_s8, 128, %s629_s6, [#allocation4]  }
 0x228   :  { %514 = dma.done.wait [#allocation4], 128  }
 0x229   :  { %515 = vsyncadd [#allocation4], 4294967168 }
 0x22a   :  { %325 = vsyncpa [#allocation3], 1 }
 0x22b   :  { %326 = vsyncpa [#allocation6], 1 }
 0x22c   :  { %327 = vsyncpa [#allocation4], 1 }

</bundles_post_ra>
